<compile_context>
chip_gen: v6e
topology: v6e:2x2x1
jax: 0.10.0
libtpu: 0.0.40
codegen_flags: <defaults>
</compile_context>

<pallas_src>
import jax
import jax.numpy as jnp
from jax.experimental import pallas as pl
from jax.experimental.pallas import tpu as pltpu


def base_modality_kernel(x_ref, w1_ref, b1_ref, w2_ref, b2_ref,
                         wp_ref, bp_ref, o_ref):
    x = x_ref[...]

    # --- preprocess: L2 normalize along feature axis (torch.norm, no eps) ---
    inv_norm = jax.lax.rsqrt(jnp.sum(x * x, axis=1, keepdims=True))
    xn = x * inv_norm

    # --- feature extractor: Linear -> ReLU -> Linear -> ReLU ---
    # Activations are cast to the weight dtype (f32 by default; bf16 when the
    # wrapper's v5e fast path is enabled). Accumulation is always f32.
    h1 = jnp.dot(xn.astype(w1_ref.dtype), w1_ref[...],
                 preferred_element_type=jnp.float32) + b1_ref[...]
    h1 = jnp.maximum(h1, 0.0)
    h2 = jnp.dot(h1.astype(w2_ref.dtype), w2_ref[...],
                 preferred_element_type=jnp.float32) + b2_ref[...]
    h2 = jnp.maximum(h2, 0.0)

    # --- projection layer ---
    p = jnp.dot(h2.astype(wp_ref.dtype), wp_ref[...],
                preferred_element_type=jnp.float32) + bp_ref[...]

    # --- F.normalize(p, p=2, dim=1): denom clamped at eps=1e-12 ---
    # clamp sum-of-squares at 1e-24  <=>  clamp norm at 1e-12
    sumsq = jnp.sum(p * p, axis=1, keepdims=True)
    inv_p = jax.lax.rsqrt(jnp.maximum(sumsq, 1e-24))
    o_ref[...] = (p * inv_p).astype(o_ref.dtype)


def _round_up(n, m):
    return ((n + m - 1) // m) * m


def base_modality_forward(x, params, *, block_b=None,
                          matmul_dtype=jnp.float32,
                          out_dtype=jnp.float32):
    """x: [B, input_dim] float32. Returns [B, embedding_dim] in out_dtype."""
    w1, b1, w2, b2, wp, bp = params
    B, D = x.shape
    E = wp.shape[1]

    # Optional v5e fast path: bf16 matmul operands (weights cast once here,
    # activations cast in-kernel). Default stays f32 to hold 1e-5 tolerance.
    if jnp.dtype(matmul_dtype) != w1.dtype:
        w1, w2, wp = (w.astype(matmul_dtype) for w in (w1, w2, wp))

    # Batch tile: multiple of 8 (sublane); target >= 2 grid steps so the
    # "parallel" batch axis can be sharded across v7x's two TensorCores; cap
    # at 2048 rows (double-buffered tiles + temps stay well under the 32 MiB
    # default scoped VMEM on every generation).
    if block_b is None:
        block_b = min(2048, _round_up(pl.cdiv(B, 2), 8))
    TB = max(8, _round_up(block_b, 8))

    # Partial last block (B % TB != 0) is handled by Pallas: padded rows are
    # garbage on read, all math is row-independent, and their output rows are
    # never written back. No host-side padding / slicing needed.
    grid = (pl.cdiv(B, TB),)

    # Weights/biases: full-array blocks pinned to (0,0) -> loaded once,
    # resident in VMEM for the whole grid.
    resident = lambda arr: pl.BlockSpec(arr.shape, lambda i: (0, 0))

    flops_per_row = 2 * (D * 256 + 256 * 128 + 128 * E)
    bytes_accessed = (
        x.size * x.dtype.itemsize
        + sum(a.size * a.dtype.itemsize for a in (w1, b1, w2, b2, wp, bp))
        + B * E * jnp.dtype(out_dtype).itemsize)

    return pl.pallas_call(
        base_modality_kernel,
        out_shape=jax.ShapeDtypeStruct((B, E), out_dtype),
        grid=grid,
        in_specs=[
            pl.BlockSpec((TB, D), lambda i: (i, 0)),   # x: batch-tiled, pipelined
            resident(w1), resident(b1),
            resident(w2), resident(b2),
            resident(wp), resident(bp),
        ],
        out_specs=pl.BlockSpec((TB, E), lambda i: (i, 0)),
        compiler_params=pltpu.CompilerParams(
            # Rows are independent -> shard the batch axis across TCs (v7x).
            # No vmem_limit_bytes override: actual footprint (~12-20 MiB) sits
            # comfortably under the 32 MiB default scoped limit.
            dimension_semantics=("parallel",),
        ),
        cost_estimate=pl.CostEstimate(
            flops=B * flops_per_row,
            transcendentals=2 * B,                     # two rsqrt per row
            bytes_accessed=bytes_accessed,
        ),
    )(x, w1, b1, w2, b2, wp, bp)


def xavier_uniform(key, fan_in, fan_out, dtype=jnp.float32):
    limit = jnp.sqrt(6.0 / (fan_in + fan_out))
    # stored as [in, out] so the kernel computes x @ W directly
    return jax.random.uniform(key, (fan_in, fan_out), dtype, -limit, limit)


def make_params(key, input_dim, embedding_dim):
    k1, k2, k3 = jax.random.split(key, 3)
    w1 = xavier_uniform(k1, input_dim, 256)
    b1 = jnp.zeros((1, 256), jnp.float32)
    w2 = xavier_uniform(k2, 256, 128)
    b2 = jnp.zeros((1, 128), jnp.float32)
    wp = xavier_uniform(k3, input_dim, embedding_dim)  # Linear(input_dim, embedding_dim)
    bp = jnp.zeros((1, embedding_dim), jnp.float32)
    return w1, b1, w2, b2, wp, bp


if __name__ == "__main__":
    # input_dim must equal 128 for the PyTorch module's forward to be
    # well-formed (projection Linear(input_dim, E) applied to 128-dim features).
    INPUT_DIM, EMBED_DIM = 128, 512

    key = jax.random.PRNGKey(0)
    kx, kp = jax.random.split(key)
    params = make_params(kp, INPUT_DIM, EMBED_DIM)
    w1, b1, w2, b2, wp, bp = params

    def reference(xr):
        xn = xr / jnp.linalg.norm(xr, axis=1, keepdims=True)
        h = jnp.maximum(xn @ w1 + b1, 0.0)
        h = jnp.maximum(h @ w2 + b2, 0.0)
        p = h @ wp + bp
        return p / jnp.maximum(jnp.linalg.norm(p, axis=1, keepdims=True), 1e-12)

    # 1) batch that is an exact multiple of the sublane tile
    x = jax.random.normal(kx, (8, INPUT_DIM), jnp.float32)
    out = jax.block_until_ready(base_modality_forward(x, params))
    assert out.shape == (8, EMBED_DIM)
    assert jnp.allclose(out, reference(x), atol=1e-5, rtol=1e-5)

    # 2) batch that is NOT a multiple of the tile: exercises the partial
    #    last block / masked writeback path that replaced host-side padding.
    x2 = jax.random.normal(kx, (12, INPUT_DIM), jnp.float32)
    out2 = jax.block_until_ready(base_modality_forward(x2, params))
    assert out2.shape == (12, EMBED_DIM)
    assert jnp.allclose(out2, reference(x2), atol=1e-5, rtol=1e-5)

    print("KERNEL_OK")
</pallas_src>

<mosaic_0001>
module attributes {stable_mosaic.version = 11 : i64} {
  func.func @base_modality_kernel(%arg0: i32, %arg1: memref<8x128xf32, #tpu.memory_space<vmem>>, %arg2: memref<128x256xf32, #tpu.memory_space<vmem>>, %arg3: memref<1x256xf32, #tpu.memory_space<vmem>>, %arg4: memref<256x128xf32, #tpu.memory_space<vmem>>, %arg5: memref<1x128xf32, #tpu.memory_space<vmem>>, %arg6: memref<128x512xf32, #tpu.memory_space<vmem>>, %arg7: memref<1x512xf32, #tpu.memory_space<vmem>>, %arg8: memref<8x512xf32, #tpu.memory_space<vmem>>) attributes {dimension_semantics = [#tpu.dimension_semantics<parallel>], iteration_bounds = array<i64: 1>, scalar_prefetch = 0 : i64, scratch_operands = 0 : i64, tpu.core_type = #tpu.core_type<tc>, window_params = [{transform_indices = @transform_0, window_bounds = array<i64: 8, 128>}, {pipeline_mode = #tpu.pipeline_mode<synchronous>, transform_indices = @transform_1, window_bounds = array<i64: 128, 256>}, {pipeline_mode = #tpu.pipeline_mode<synchronous>, transform_indices = @transform_2, window_bounds = array<i64: 1, 256>}, {pipeline_mode = #tpu.pipeline_mode<synchronous>, transform_indices = @transform_3, window_bounds = array<i64: 256, 128>}, {pipeline_mode = #tpu.pipeline_mode<synchronous>, transform_indices = @transform_4, window_bounds = array<i64: 1, 128>}, {pipeline_mode = #tpu.pipeline_mode<synchronous>, transform_indices = @transform_5, window_bounds = array<i64: 128, 512>}, {pipeline_mode = #tpu.pipeline_mode<synchronous>, transform_indices = @transform_6, window_bounds = array<i64: 1, 512>}, {transform_indices = @transform_7, window_bounds = array<i64: 8, 512>}]} {
    %c0 = arith.constant 0 : index
    %c0_0 = arith.constant 0 : index
    %0 = vector.load %arg1[%c0, %c0_0] : memref<8x128xf32, #tpu.memory_space<vmem>>, vector<8x128xf32>
    %1 = arith.mulf %0, %0 : vector<8x128xf32>
    %cst = arith.constant dense<0.000000e+00> : vector<8xf32>
    %2 = vector.multi_reduction <add>, %1, %cst [1] : vector<8x128xf32> to vector<8xf32>
    %3 = vector.shape_cast %2 : vector<8xf32> to vector<8x1xf32>
    %4 = math.rsqrt %3 : vector<8x1xf32>
    %5 = vector.broadcast %4 : vector<8x1xf32> to vector<8x128xf32>
    %6 = arith.mulf %0, %5 : vector<8x128xf32>
    %c0_1 = arith.constant 0 : index
    %c0_2 = arith.constant 0 : index
    %7 = vector.load %arg2[%c0_1, %c0_2] : memref<128x256xf32, #tpu.memory_space<vmem>>, vector<128x256xf32>
    %cst_3 = arith.constant dense<0.000000e+00> : vector<8x256xf32>
    %8 = tpu.matmul %6, %7, %cst_3 {dimension_numbers = #tpu.dot_dimension_numbers<[1], [0], [0], [1], [0, 0, 1, 1], [], []>} : vector<8x128xf32>, vector<128x256xf32>, vector<8x256xf32> -> vector<8x256xf32>
    %c0_4 = arith.constant 0 : index
    %c0_5 = arith.constant 0 : index
    %9 = vector.load %arg3[%c0_4, %c0_5] : memref<1x256xf32, #tpu.memory_space<vmem>>, vector<1x256xf32>
    %10 = vector.broadcast %9 : vector<1x256xf32> to vector<8x256xf32>
    %11 = arith.addf %8, %10 : vector<8x256xf32>
    %cst_6 = arith.constant 0.000000e+00 : f32
    %12 = vector.broadcast %cst_6 : f32 to vector<8x256xf32>
    %13 = arith.maximumf %11, %12 : vector<8x256xf32>
    %c0_7 = arith.constant 0 : index
    %c0_8 = arith.constant 0 : index
    %14 = vector.load %arg4[%c0_7, %c0_8] : memref<256x128xf32, #tpu.memory_space<vmem>>, vector<256x128xf32>
    %cst_9 = arith.constant dense<0.000000e+00> : vector<8x128xf32>
    %15 = tpu.matmul %13, %14, %cst_9 {dimension_numbers = #tpu.dot_dimension_numbers<[1], [0], [0], [1], [0, 0, 1, 1], [], []>} : vector<8x256xf32>, vector<256x128xf32>, vector<8x128xf32> -> vector<8x128xf32>
    %c0_10 = arith.constant 0 : index
    %c0_11 = arith.constant 0 : index
    %16 = vector.load %arg5[%c0_10, %c0_11] : memref<1x128xf32, #tpu.memory_space<vmem>>, vector<1x128xf32>
    %17 = vector.broadcast %16 : vector<1x128xf32> to vector<8x128xf32>
    %18 = arith.addf %15, %17 : vector<8x128xf32>
    %cst_12 = arith.constant 0.000000e+00 : f32
    %19 = vector.broadcast %cst_12 : f32 to vector<8x128xf32>
    %20 = arith.maximumf %18, %19 : vector<8x128xf32>
    %c0_13 = arith.constant 0 : index
    %c0_14 = arith.constant 0 : index
    %21 = vector.load %arg6[%c0_13, %c0_14] : memref<128x512xf32, #tpu.memory_space<vmem>>, vector<128x512xf32>
    %cst_15 = arith.constant dense<0.000000e+00> : vector<8x512xf32>
    %22 = tpu.matmul %20, %21, %cst_15 {dimension_numbers = #tpu.dot_dimension_numbers<[1], [0], [0], [1], [0, 0, 1, 1], [], []>} : vector<8x128xf32>, vector<128x512xf32>, vector<8x512xf32> -> vector<8x512xf32>
    %c0_16 = arith.constant 0 : index
    %c0_17 = arith.constant 0 : index
    %23 = vector.load %arg7[%c0_16, %c0_17] : memref<1x512xf32, #tpu.memory_space<vmem>>, vector<1x512xf32>
    %24 = vector.broadcast %23 : vector<1x512xf32> to vector<8x512xf32>
    %25 = arith.addf %22, %24 : vector<8x512xf32>
    %26 = arith.mulf %25, %25 : vector<8x512xf32>
    %cst_18 = arith.constant dense<0.000000e+00> : vector<8xf32>
    %27 = vector.multi_reduction <add>, %26, %cst_18 [1] : vector<8x512xf32> to vector<8xf32>
    %28 = vector.shape_cast %27 : vector<8xf32> to vector<8x1xf32>
    %cst_19 = arith.constant 1.000000e-24 : f32
    %29 = vector.broadcast %cst_19 : f32 to vector<8x1xf32>
    %30 = arith.maximumf %28, %29 : vector<8x1xf32>
    %31 = math.rsqrt %30 : vector<8x1xf32>
    %32 = vector.broadcast %31 : vector<8x1xf32> to vector<8x512xf32>
    %33 = arith.mulf %25, %32 : vector<8x512xf32>
    %c0_20 = arith.constant 0 : index
    %c0_21 = arith.constant 0 : index
    %34 = vector.load %arg8[%c0_20, %c0_21] : memref<8x512xf32, #tpu.memory_space<vmem>>, vector<8x512xf32>
    tpu.vector_store %arg8[%c0_20, %c0_21], %33 {strides = array<i32>} : memref<8x512xf32, #tpu.memory_space<vmem>>, vector<8x512xf32>,
    return
  }
  func.func @transform_0(%arg0: i32) -> (i32, i32) {
    %c0_i32 = arith.constant 0 : i32
    %c0_i32_0 = arith.constant 0 : i32
    return %arg0, %c0_i32 : i32, i32
  }
  func.func @transform_1(%arg0: i32) -> (i32, i32) {
    %c0_i32 = arith.constant 0 : i32
    %c0_i32_0 = arith.constant 0 : i32
    %c0_i32_1 = arith.constant 0 : i32
    return %c0_i32, %c0_i32_0 : i32, i32
  }
  func.func @transform_2(%arg0: i32) -> (i32, i32) {
    %c0_i32 = arith.constant 0 : i32
    %c0_i32_0 = arith.constant 0 : i32
    %c0_i32_1 = arith.constant 0 : i32
    return %c0_i32, %c0_i32_0 : i32, i32
  }
  func.func @transform_3(%arg0: i32) -> (i32, i32) {
    %c0_i32 = arith.constant 0 : i32
    %c0_i32_0 = arith.constant 0 : i32
    %c0_i32_1 = arith.constant 0 : i32
    return %c0_i32, %c0_i32_0 : i32, i32
  }
  func.func @transform_4(%arg0: i32) -> (i32, i32) {
    %c0_i32 = arith.constant 0 : i32
    %c0_i32_0 = arith.constant 0 : i32
    %c0_i32_1 = arith.constant 0 : i32
    return %c0_i32, %c0_i32_0 : i32, i32
  }
  func.func @transform_5(%arg0: i32) -> (i32, i32) {
    %c0_i32 = arith.constant 0 : i32
    %c0_i32_0 = arith.constant 0 : i32
    %c0_i32_1 = arith.constant 0 : i32
    return %c0_i32, %c0_i32_0 : i32, i32
  }
  func.func @transform_6(%arg0: i32) -> (i32, i32) {
    %c0_i32 = arith.constant 0 : i32
    %c0_i32_0 = arith.constant 0 : i32
    %c0_i32_1 = arith.constant 0 : i32
    return %c0_i32, %c0_i32_0 : i32, i32
  }
  func.func @transform_7(%arg0: i32) -> (i32, i32) {
    %c0_i32 = arith.constant 0 : i32
    %c0_i32_0 = arith.constant 0 : i32
    return %arg0, %c0_i32 : i32, i32
  }
}

</mosaic_0001>

<bundles_post_ra>
// kernel: tpu_custom_call.1
= control target key start
LH: loop header
LB: loop body
LE: loop exit
PB: predicated region body
PF: predicated region fallthrough
CT: control target
= control target key end

     0   :  { %12 = vsyncpa [#allocation3], 0  ;;  %s835_s0 = inlined_call_operand.hbm [shape: f32[8,128], index: 0, kind: input, shape index: {}]   ;;  %s836_s1 = inlined_call_operand.hbm [shape: f32[128,256], index: 1, kind: input, shape index: {}]   ;;  %s837_s2 = inlined_call_operand.vmem [shape: f32[1,256], index: 2, kind: input, shape index: {}]   ;;  %s838_s3 = inlined_call_operand.hbm [shape: f32[256,128], index: 3, kind: input, shape index: {}]   ;;  %s839_s4 = inlined_call_operand.vmem [shape: f32[1,128], index: 4, kind: input, shape index: {}]   ;;  %s840_s5 = inlined_call_operand.hbm [shape: f32[128,512], index: 5, kind: input, shape index: {}]   ;;  %s841_s6 = inlined_call_operand.vmem [shape: f32[1,512], index: 6, kind: input, shape index: {}]   ;;  %s842_s7 = inlined_call_operand.hbm [shape: f32[8,512], index: 7, kind: output, shape index: {}]  }
   0x1   :  { %13 = vsyncpa [#allocation6], 0 }
   0x2   :  { %14 = vsyncpa [#allocation9], 0 }
   0x3   :  { %15 = vsyncpa [#allocation4], 0  ;;  %s737_s24 = smov [#allocation5]  }
   0x4   :  { %s31_s25 = sshll.u32 %s737_s24, 4  ;;  %s32_s25 = int_to_ptr.vmem [resolvable:$true] %s31_s25 }
   0x5   :  { %s637_s26 = scalar_lea.vmem %s32_s25, 4096  ;;  %p642_p1 = scmp.lt.s32.totalorder %s32_s25, %s32_s25 }
   0x6   :  { %p638_p0 = scmp.ne.s32.totalorder %s32_s25, %s637_s26  ;;  %p643_p2 = scmp.lt.s32.totalorder %s637_s26, %s637_s26 }
   0x8   :  { %p644_p3 = por %p643_p2, %p642_p1 }
   0xa   :  { %p645_p4 = pnand %p644_p3, %p638_p0 }
   0xc   :  { %648 = shalt.err (!%p645_p4)
}
   0xd   :  { %s738_s27 = smov 256   ;;  %s739_s28 = smov 16  }
   0xe   :  { %37 = dma.hbm_to_vmem [thread:$0]  %s836_s1, 4096, %s32_s25, [#allocation6], %s738_s27, %s738_s27, %s739_s28  }
   0xf   :  { %s740_s8 = smov [#allocation2]   ;;  %s741_s10 = smov [#allocation7]  }
  0x10   :  { %s22_s9 = sshll.u32 %s740_s8, 4  ;;  %s45_s11 = sshll.u32 %s741_s10, 4  ;;  %s23_s9 = int_to_ptr.vmem [resolvable:$true] %s22_s9  ;;  %s46_s11 = int_to_ptr.vmem [resolvable:$true] %s45_s11 }
  0x11   :  { %s657_s12 = scalar_lea.vmem %s23_s9, 128  ;;  %p662_p6 = scmp.lt.s32.totalorder %s23_s9, %s23_s9 }
  0x12   :  { %p658_p5 = scmp.ne.s32.totalorder %s23_s9, %s657_s12  ;;  %p663_p7 = scmp.lt.s32.totalorder %s657_s12, %s657_s12 }
  0x14   :  { %p664_p8 = por %p663_p7, %p662_p6 }
  0x16   :  { %p665_p9 = pnand %p664_p8, %p658_p5 }
  0x18   :  { %668 = shalt.err (!%p665_p9)
}
  0x19   :  { %25 = dma.hbm_to_vmem [thread:$0]  %s835_s0, 128, %s23_s9, [#allocation3]  }
  0x1a   :  { %s677_s15 = scalar_lea.vmem %s46_s11, 4096  ;;  %p682_p11 = scmp.lt.s32.totalorder %s46_s11, %s46_s11 }
  0x1b   :  { %p678_p10 = scmp.ne.s32.totalorder %s46_s11, %s677_s15  ;;  %p683_p12 = scmp.lt.s32.totalorder %s677_s15, %s677_s15 }
  0x1d   :  { %p684_p13 = por %p683_p12, %p682_p11 }
  0x1f   :  { %p685_p0 = pnand %p684_p13, %p678_p10 }
  0x21   :  { %688 = shalt.err (!%p685_p0)
}
  0x22   :  { %s742_s1 = smov 128   ;;  %s743_s16 = smov 8  }
  0x23   :  { %51 = dma.hbm_to_vmem [thread:$0]  %s838_s3, 4096, %s46_s11, [#allocation6], %s742_s1, %s742_s1, %s743_s16  }
  0x24   :  { %s744_s19 = smov [#allocation8]  }
  0x25   :  { %s59_s20 = sshll.u32 %s744_s19, 4  ;;  %s60_s20 = int_to_ptr.vmem [resolvable:$true] %s59_s20 }
  0x26   :  { %s697_s21 = scalar_lea.vmem %s60_s20, 8192  ;;  %p702_p2 = scmp.lt.s32.totalorder %s60_s20, %s60_s20 }
  0x27   :  { %p698_p1 = scmp.ne.s32.totalorder %s60_s20, %s697_s21  ;;  %p703_p3 = scmp.lt.s32.totalorder %s697_s21, %s697_s21 }
  0x29   :  { %p704_p4 = por %p703_p3, %p702_p2 }
  0x2b   :  { %p705_p5 = pnand %p704_p4, %p698_p1 }
  0x2d   :  { %708 = shalt.err (!%p705_p5)
}
  0x2e   :  { %s745_s0 = smov 512   ;;  %s746_s22 = smov 32  }
  0x2f   :  { %65 = dma.hbm_to_vmem [thread:$0]  %s840_s5, 8192, %s60_s20, [#allocation9], %s745_s0, %s745_s0, %s746_s22  }
  0x30   :  { %729 = dma.done.wait [#allocation3], 128  }
  0x31   :  { %730 = vsyncadd [#allocation3], 4294967168 }
  0x32   :  { %731 = dma.done.wait [#allocation6], 8192  }
  0x33   :  { %732 = vsyncadd [#allocation6], 4294959104 }
  0x34   :  { %733 = dma.done.wait [#allocation9], 8192  }
  0x35   :  { %734 = vsyncadd [#allocation9], 4294959104  ;;  %v801_v0 = vld [vmem:[#allocation2] sm:$0xff]  ;;  %v116_v2 = vld [vmem:[#allocation5 + $0xf0] sm:$0xff]  ;;  %v747_v19 = vmov 0.0  }
  0x36   :  { %v117_v1 = vld [vmem:[#allocation5 + $0xf8] sm:$0xff]  ;;  %v81_v3 = vmul.f32 %v801_v0, %v801_v0  ;;  %v115_v4 = vld [vmem:[#allocation5 + $0xe8] sm:$0xff]  ;;  %v114_v5 = vld [vmem:[#allocation5 + $0xe0] sm:$0xff]  ;;  %194 = vmatprep.mubr.f32.mxu0 %v747_v19 }
  0x37   :  { %130 = vmatprep.subr.mxu0 %v117_v1  ;;  %v113_v6 = vld [vmem:[#allocation5 + $0xd8] sm:$0xff]  ;;  %v112_v7 = vld [vmem:[#allocation5 + $0xd0] sm:$0xff]  ;;  %v111_v8 = vld [vmem:[#allocation5 + $0xc8] sm:$0xff] }
  0x38   :  { %131 = vmatpush1.msra.mxu0 %v116_v2  ;;  %82 = vadd.xlane.f32.xlu0 %v81_v3  ;;  %v110_v9 = vld [vmem:[#allocation5 + $0xc0] sm:$0xff]  ;;  %v109_v10 = vld [vmem:[#allocation5 + $0xb8] sm:$0xff]  ;;  %v108_v11 = vld [vmem:[#allocation5 + $0xb0] sm:$0xff] }
  0x39   :  { %132 = vmatprep.subr.mxu0 %v115_v4  ;;  %v107_v12 = vld [vmem:[#allocation5 + $0xa8] sm:$0xff]  ;;  %v106_v13 = vld [vmem:[#allocation5 + $0xa0] sm:$0xff]  ;;  %v105_v14 = vld [vmem:[#allocation5 + $0x98] sm:$0xff] }
  0x3a   :  { %133 = vmatpush1.msra.mxu0 %v114_v5  ;;  %v104_v15 = vld [vmem:[#allocation5 + $0x90] sm:$0xff]  ;;  %v103_v16 = vld [vmem:[#allocation5 + $0x88] sm:$0xff]  ;;  %v102_v17 = vld [vmem:[#allocation5 + $0x80] sm:$0xff] }
  0x3b   :  { %134 = vmatprep.subr.mxu0 %v113_v6  ;;  %v101_v18 = vld [vmem:[#allocation5 + $0x78] sm:$0xff]  ;;  %v100_v20 = vld [vmem:[#allocation5 + $0x70] sm:$0xff]  ;;  %v99_v21 = vld [vmem:[#allocation5 + $0x68] sm:$0xff] }
  0x3c   :  { %135 = vmatpush1.msra.mxu0 %v112_v7  ;;  %v98_v22 = vld [vmem:[#allocation5 + $0x60] sm:$0xff]  ;;  %v97_v23 = vld [vmem:[#allocation5 + $0x58] sm:$0xff]  ;;  %v96_v24 = vld [vmem:[#allocation5 + $0x50] sm:$0xff] }
  0x3d   :  { %136 = vmatprep.subr.mxu0 %v111_v8  ;;  %v95_v25 = vld [vmem:[#allocation5 + $0x48] sm:$0xff]  ;;  %v94_v26 = vld [vmem:[#allocation5 + $0x40] sm:$0xff]  ;;  %v93_v27 = vld [vmem:[#allocation5 + $0x38] sm:$0xff] }
  0x3e   :  { %137 = vmatpush1.msra.mxu0 %v110_v9  ;;  %v92_v28 = vld [vmem:[#allocation5 + $0x30] sm:$0xff]  ;;  %v91_v29 = vld [vmem:[#allocation5 + $0x28] sm:$0xff]  ;;  %v90_v30 = vld [vmem:[#allocation5 + $0x20] sm:$0xff] }
  0x3f   :  { %138 = vmatprep.subr.mxu0 %v109_v10  ;;  %v89_v31 = vld [vmem:[#allocation5 + $0x18] sm:$0xff]  ;;  %v88_v32 = vld [vmem:[#allocation5 + $0x10] sm:$0xff]  ;;  %v87_v33 = vld [vmem:[#allocation5 + $0x8] sm:$0xff] }
  0x40   :  { %139 = vmatpush1.msra.mxu0 %v108_v11  ;;  %v86_v34 = vld [vmem:[#allocation5] sm:$0xff]  ;;  %v234_v35 = vld [vmem:[#allocation7 + $0xf8] sm:$0xff]  ;;  %v233_v37 = vld [vmem:[#allocation7 + $0xf0] sm:$0xff] }
  0x41   :  { %140 = vmatprep.subr.mxu0 %v107_v12  ;;  %v218_v36 = vld [vmem:[#allocation7 + $0x78] sm:$0xff]  ;;  %578 = vmatprep.subr.mxu1 %v234_v35  ;;  %v217_v38 = vld [vmem:[#allocation7 + $0x70] sm:$0xff]  ;;  %v232_v39 = vld [vmem:[#allocation7 + $0xe8] sm:$0xff] }
  0x42   :  { %141 = vmatpush1.msra.mxu0 %v106_v13  ;;  %579 = vmatpush3.msra.mxu1 %v218_v36  ;;  %v216_v40 = vld [vmem:[#allocation7 + $0x68] sm:$0xff]  ;;  %v231_v41 = vld [vmem:[#allocation7 + $0xe0] sm:$0xff]  ;;  %v230_v43 = vld [vmem:[#allocation7 + $0xd8] sm:$0xff] }
  0x43   :  { %142 = vmatprep.subr.mxu0 %v105_v14  ;;  %580 = vmatprep.subr.mxu1 %v233_v37  ;;  %v215_v42 = vld [vmem:[#allocation7 + $0x60] sm:$0xff]  ;;  %v214_v44 = vld [vmem:[#allocation7 + $0x58] sm:$0xff]  ;;  %v229_v45 = vld [vmem:[#allocation7 + $0xd0] sm:$0xff] }
  0x44   :  { %143 = vmatpush1.msra.mxu0 %v104_v15  ;;  %581 = vmatpush3.msra.mxu1 %v217_v38  ;;  %v213_v46 = vld [vmem:[#allocation7 + $0x50] sm:$0xff]  ;;  %v228_v47 = vld [vmem:[#allocation7 + $0xc8] sm:$0xff]  ;;  %v227_v49 = vld [vmem:[#allocation7 + $0xc0] sm:$0xff] }
  0x45   :  { %144 = vmatprep.subr.mxu0 %v103_v16  ;;  %582 = vmatprep.subr.mxu1 %v232_v39  ;;  %v212_v48 = vld [vmem:[#allocation7 + $0x48] sm:$0xff]  ;;  %v211_v50 = vld [vmem:[#allocation7 + $0x40] sm:$0xff]  ;;  %v226_v51 = vld [vmem:[#allocation7 + $0xb8] sm:$0xff] }
  0x46   :  { %145 = vmatpush1.msra.mxu0 %v102_v17  ;;  %583 = vmatpush3.msra.mxu1 %v216_v40  ;;  %v210_v52 = vld [vmem:[#allocation7 + $0x38] sm:$0xff]  ;;  %v225_v53 = vld [vmem:[#allocation7 + $0xb0] sm:$0xff]  ;;  %v224_v55 = vld [vmem:[#allocation7 + $0xa8] sm:$0xff] }
  0x47   :  { %146 = vmatprep.subr.mxu0 %v101_v18  ;;  %584 = vmatprep.subr.mxu1 %v231_v41  ;;  %v209_v54 = vld [vmem:[#allocation7 + $0x30] sm:$0xff]  ;;  %v208_v56 = vld [vmem:[#allocation7 + $0x28] sm:$0xff]  ;;  %v223_v57 = vld [vmem:[#allocation7 + $0xa0] sm:$0xff] }
  0x48   :  { %147 = vmatpush1.msra.mxu0 %v100_v20  ;;  %585 = vmatpush3.msra.mxu1 %v215_v42  ;;  %v207_v58 = vld [vmem:[#allocation7 + $0x20] sm:$0xff]  ;;  %v222_v62 = vld [vmem:[#allocation7 + $0x98] sm:$0xff]  ;;  %v221_v1 = vld [vmem:[#allocation7 + $0x90] sm:$0xff] }
  0x49   :  { %148 = vmatprep.subr.mxu0 %v99_v21  ;;  %586 = vmatprep.subr.mxu1 %v230_v43  ;;  %v206_v63 = vld [vmem:[#allocation7 + $0x18] sm:$0xff]  ;;  %v205_v2 = vld [vmem:[#allocation7 + $0x10] sm:$0xff]  ;;  %v220_v3 = vld [vmem:[#allocation7 + $0x88] sm:$0xff] }
  0x4a   :  { %149 = vmatpush1.msra.mxu0 %v98_v22  ;;  %587 = vmatpush3.msra.mxu1 %v214_v44  ;;  %v204_v4 = vld [vmem:[#allocation7 + $0x8] sm:$0xff]  ;;  %v219_v5 = vld [vmem:[#allocation7 + $0x80] sm:$0xff]  ;;  %v376_v7 = vld [vmem:[#allocation8 + $0x1f8] sm:$0xff] }
  0x4b   :  { %150 = vmatprep.subr.mxu0 %v97_v23  ;;  %588 = vmatprep.subr.mxu1 %v229_v45  ;;  %v203_v6 = vld [vmem:[#allocation7] sm:$0xff]  ;;  %v370_v9 = vld [vmem:[#allocation8 + $0x1c8] sm:$0xff]  ;;  %v375_v44 = vld [vmem:[#allocation8 + $0x1f0] sm:$0xff] }
  0x4c   :  { %151 = vmatpush1.msra.mxu0 %v96_v24  ;;  %589 = vmatpush3.msra.mxu1 %v213_v46  ;;  %v373_v8 = vld [vmem:[#allocation8 + $0x1e0] sm:$0xff]  ;;  %v366_v11 = vld [vmem:[#allocation8 + $0x1a8] sm:$0xff]  ;;  %v372_v45 = vld [vmem:[#allocation8 + $0x1d8] sm:$0xff] }
  0x4d   :  { %152 = vmatprep.subr.mxu0 %v95_v25  ;;  %590 = vmatprep.subr.mxu1 %v228_v47  ;;  %v369_v10 = vld [vmem:[#allocation8 + $0x1c0] sm:$0xff]  ;;  %v362_v13 = vld [vmem:[#allocation8 + $0x188] sm:$0xff]  ;;  %v371_v46 = vld [vmem:[#allocation8 + $0x1d0] sm:$0xff] }
  0x4e   :  { %153 = vmatpush1.msra.mxu0 %v94_v26  ;;  %591 = vmatpush3.msra.mxu1 %v212_v48  ;;  %v365_v12 = vld [vmem:[#allocation8 + $0x1a0] sm:$0xff]  ;;  %v358_v15 = vld [vmem:[#allocation8 + $0x168] sm:$0xff]  ;;  %v368_v47 = vld [vmem:[#allocation8 + $0x1b8] sm:$0xff] }
  0x4f   :  { %154 = vmatprep.subr.mxu0 %v93_v27  ;;  %592 = vmatprep.subr.mxu1 %v227_v49  ;;  %v361_v14 = vld [vmem:[#allocation8 + $0x180] sm:$0xff]  ;;  %v354_v17 = vld [vmem:[#allocation8 + $0x148] sm:$0xff]  ;;  %v367_v48 = vld [vmem:[#allocation8 + $0x1b0] sm:$0xff] }
  0x50   :  { %155 = vmatpush1.msra.mxu0 %v92_v28  ;;  %593 = vmatpush3.msra.mxu1 %v211_v50  ;;  %v357_v16 = vld [vmem:[#allocation8 + $0x160] sm:$0xff]  ;;  %v350_v20 = vld [vmem:[#allocation8 + $0x128] sm:$0xff]  ;;  %v364_v49 = vld [vmem:[#allocation8 + $0x198] sm:$0xff] }
  0x51   :  { %156 = vmatprep.subr.mxu0 %v91_v29  ;;  %594 = vmatprep.subr.mxu1 %v226_v51  ;;  %v353_v18 = vld [vmem:[#allocation8 + $0x140] sm:$0xff]  ;;  %v346_v22 = vld [vmem:[#allocation8 + $0x108] sm:$0xff]  ;;  %v363_v50 = vld [vmem:[#allocation8 + $0x190] sm:$0xff] }
  0x52   :  { %157 = vmatpush1.msra.mxu0 %v90_v30  ;;  %595 = vmatpush3.msra.mxu1 %v210_v52  ;;  %v349_v21 = vld [vmem:[#allocation8 + $0x120] sm:$0xff]  ;;  %v342_v24 = vld [vmem:[#allocation8 + $0xe8] sm:$0xff]  ;;  %v360_v51 = vld [vmem:[#allocation8 + $0x178] sm:$0xff] }
  0x53   :  { %158 = vmatprep.subr.mxu0 %v89_v31  ;;  %596 = vmatprep.subr.mxu1 %v225_v53  ;;  %v345_v23 = vld [vmem:[#allocation8 + $0x100] sm:$0xff]  ;;  %v338_v26 = vld [vmem:[#allocation8 + $0xc8] sm:$0xff]  ;;  %v120_v31 = vlaneseq  ;;  %v359_v52 = vld [vmem:[#allocation8 + $0x170] sm:$0xff] }
  0x54   :  { %159 = vmatpush1.msra.mxu0 %v88_v32  ;;  %597 = vmatpush3.msra.mxu1 %v209_v54  ;;  %v341_v25 = vld [vmem:[#allocation8 + $0xe0] sm:$0xff]  ;;  %v334_v28 = vld [vmem:[#allocation8 + $0xa8] sm:$0xff]  ;;  %v356_v53 = vld [vmem:[#allocation8 + $0x158] sm:$0xff] }
  0x55   :  { %160 = vmatprep.subr.mxu0 %v87_v33  ;;  %598 = vmatprep.subr.mxu1 %v224_v55  ;;  %v337_v27 = vld [vmem:[#allocation8 + $0xc0] sm:$0xff]  ;;  %v330_v30 = vld [vmem:[#allocation8 + $0x88] sm:$0xff]  ;;  %v808_v32 = vshrl.u32 %v120_v31, 7  ;;  %v355_v54 = vld [vmem:[#allocation8 + $0x150] sm:$0xff] }
  0x56   :  { %161 = vmatpush1.msra.mxu0 %v86_v34  ;;  %599 = vmatpush3.msra.mxu1 %v208_v56  ;;  %v333_v29 = vld [vmem:[#allocation8 + $0xa0] sm:$0xff]  ;;  %v118_v34 = vld [vmem:[%s837_s2] sm:$0x3]  ;;  %v351_v56 = vld [vmem:[#allocation8 + $0x130] sm:$0xff] }
  0x57   :  { %600 = vmatprep.subr.mxu1 %v223_v57  ;;  %v122_v33 = vsub.s32 0, %v808_v32  ;;  %v126_v35 = vsub.s32 1, %v808_v32  ;;  %v352_v55 = vld [vmem:[#allocation8 + $0x138] sm:$0xff]  ;;  %v347_v57 = vld [vmem:[#allocation8 + $0x110] sm:$0xff] }
  0x58   :  { %601 = vmatpush3.msra.mxu1 %v207_v58  ;;  %v344_v58 = vld [vmem:[#allocation8 + $0xf8] sm:$0xff] }
  0x59   :  { %602 = vmatprep.subr.mxu1 %v222_v62  ;;  %v123_v36 = vrot.slane %v118_v34, %v122_v33  ;;  %v127_v37 = vrot.slane %v118_v34, %v126_v35  ;;  %v336_v62 = vld [vmem:[#allocation8 + $0xb8] sm:$0xff] }
  0x5a   :  { %603 = vmatpush3.msra.mxu1 %v206_v63  ;;  %v335_v63 = vld [vmem:[#allocation8 + $0xb0] sm:$0xff] }
  0x5b   :  { %604 = vmatprep.subr.mxu1 %v221_v1  ;;  %v332_v1 = vld [vmem:[#allocation8 + $0x98] sm:$0xff] }
  0x5c   :  { %605 = vmatpush3.msra.mxu1 %v205_v2  ;;  %v329_v2 = vld [vmem:[#allocation8 + $0x80] sm:$0xff] }
  0x5d   :  { %606 = vmatprep.subr.mxu1 %v220_v3  ;;  %v331_v3 = vld [vmem:[#allocation8 + $0x90] sm:$0xff] }
  0x5e   :  { %607 = vmatpush3.msra.mxu1 %v204_v4  ;;  %v326_v4 = vld [vmem:[#allocation8 + $0x68] sm:$0xff] }
  0x5f   :  { %608 = vmatprep.subr.mxu1 %v219_v5  ;;  %v328_v5 = vld [vmem:[#allocation8 + $0x78] sm:$0xff] }
  0x60   :  { %609 = vmatpush3.msra.mxu1 %v203_v6  ;;  %v325_v6 = vld [vmem:[#allocation8 + $0x60] sm:$0xff] }
  0x61   :  { %470 = vmatprep.subr.mxu1 %v376_v7  ;;  %v322_v7 = vld [vmem:[#allocation8 + $0x48] sm:$0xff] }
  0xc1   :  { %v83_v59 = vpop.xlane.xlu0 %82 }
  0xc2   :  { %625 = vrsqrt.f32 %v83_v59  ;;  %v343_v59 = vld [vmem:[#allocation8 + $0xf0] sm:$0xff] }
  0xcf   :  { %v626_v60 = vpop.eup %625 }
  0xd0   :  { %v85_v61 = vmul.f32 %v626_v60, %v801_v0  ;;  %v374_v0 = vld [vmem:[#allocation8 + $0x1e8] sm:$0xff]  ;;  %v340_v60 = vld [vmem:[#allocation8 + $0xd8] sm:$0xff] }
  0xd1   :  { %399 = vmatprep.subr.mxu0 %v374_v0  ;;  %v327_v0 = vld [vmem:[#allocation8 + $0x70] sm:$0xff] }
  0xd2   :  { %195 = vmatmul.mubr.f32.vlgmr.msra.gmra.mxu0 %v85_v61  ;;  %v339_v61 = vld [vmem:[#allocation8 + $0xd0] sm:$0xff] }
  0xd3   :  { %463 = vmatprep.mubr.f32.mxu0 %v747_v19  ;;  %400 = vmatpush1.msra.mxu0 %v373_v8  ;;  %v324_v8 = vld [vmem:[#allocation8 + $0x58] sm:$0xff] }
  0xd4   :  { %401 = vmatprep.subr.mxu0 %v370_v9  ;;  %v321_v9 = vld [vmem:[#allocation8 + $0x40] sm:$0xff] }
  0xd5   :  { %402 = vmatpush1.msra.mxu0 %v369_v10  ;;  %v323_v10 = vld [vmem:[#allocation8 + $0x50] sm:$0xff] }
  0xd6   :  { %403 = vmatprep.subr.mxu0 %v366_v11  ;;  %v318_v11 = vld [vmem:[#allocation8 + $0x28] sm:$0xff] }
  0xd7   :  { %404 = vmatpush1.msra.mxu0 %v365_v12  ;;  %v320_v12 = vld [vmem:[#allocation8 + $0x38] sm:$0xff] }
  0xd8   :  { %405 = vmatprep.subr.mxu0 %v362_v13  ;;  %v317_v13 = vld [vmem:[#allocation8 + $0x20] sm:$0xff] }
  0xd9   :  { %406 = vmatpush1.msra.mxu0 %v361_v14  ;;  %v319_v14 = vld [vmem:[#allocation8 + $0x30] sm:$0xff] }
  0xda   :  { %407 = vmatprep.subr.mxu0 %v358_v15  ;;  %v314_v15 = vld [vmem:[#allocation8 + $0x8] sm:$0xff] }
  0xdb   :  { %408 = vmatpush1.msra.mxu0 %v357_v16  ;;  %v316_v16 = vld [vmem:[#allocation8 + $0x18] sm:$0xff] }
  0xdc   :  { %409 = vmatprep.subr.mxu0 %v354_v17  ;;  %v313_v17 = vld [vmem:[#allocation8] sm:$0xff] }
  0xdd   :  { %410 = vmatpush1.msra.mxu0 %v353_v18  ;;  %v315_v18 = vld [vmem:[#allocation8 + $0x10] sm:$0xff] }
  0xde   :  { %411 = vmatprep.subr.mxu0 %v350_v20 }
  0xdf   :  { %412 = vmatpush1.msra.mxu0 %v349_v21  ;;  %v577_v21 = vld [vmem:[%s839_s4] ss:$0 sm:$0xff]  ;;  %s748_s4 = smov [#allocation10]  }
  0xe0   :  { %413 = vmatprep.subr.mxu0 %v346_v22 }
  0xe1   :  { %414 = vmatpush1.msra.mxu0 %v345_v23 }
  0xe2   :  { %415 = vmatprep.subr.mxu0 %v342_v24 }
  0xe3   :  { %416 = vmatpush1.msra.mxu0 %v341_v25 }
  0xe4   :  { %417 = vmatprep.subr.mxu0 %v338_v26  ;;  %v377_v26 = vld [vmem:[%s841_s6] sm:$0xf]  ;;  %s566_s6 = sshll.u32 %s748_s4, 4  ;;  %s567_s6 = int_to_ptr.vmem [resolvable:$true] %s566_s6 }
  0xe5   :  { %418 = vmatpush1.msra.mxu0 %v337_v27  ;;  %v389_v27 = vsub.s32 2, %v808_v32  ;;  %v386_v31 = vrot.slane %v377_v26, %v126_v35  ;;  %s709_s28 = scalar_lea.vmem %s567_s6, 512  ;;  %p714_p7 = scmp.lt.s32.totalorder %s567_s6, %s567_s6 }
  0xe6   :  { %419 = vmatprep.subr.mxu0 %v334_v28  ;;  %v382_v28 = vrot.slane %v377_v26, %v122_v33  ;;  %p710_p6 = scmp.ne.s32.totalorder %s567_s6, %s709_s28  ;;  %p715_p8 = scmp.lt.s32.totalorder %s709_s28, %s709_s28 }
  0xe7   :  { %420 = vmatpush1.msra.mxu0 %v333_v29  ;;  %v393_v29 = vsub.s32 3, %v808_v32 }
  0xe8   :  { %421 = vmatprep.subr.mxu0 %v330_v30  ;;  %v390_v30 = vrot.slane %v377_v26, %v389_v27  ;;  %p716_p9 = por %p715_p8, %p714_p7 }
  0xe9   :  { %422 = vmatpush1.msra.mxu0 %v329_v2 }
  0xea   :  { %423 = vmatprep.subr.mxu0 %v326_v4  ;;  %p717_p10 = pnand %p716_p9, %p710_p6 }
  0xeb   :  { %424 = vmatpush1.msra.mxu0 %v325_v6 }
  0xec   :  { %425 = vmatprep.subr.mxu0 %v322_v7 }
  0xed   :  { %426 = vmatpush1.msra.mxu0 %v321_v9 }
  0xee   :  { %427 = vmatprep.subr.mxu0 %v318_v11 }
  0xef   :  { %428 = vmatpush1.msra.mxu0 %v317_v13 }
  0xf0   :  { %429 = vmatprep.subr.mxu0 %v314_v15 }
  0xf1   :  { %430 = vmatpush1.msra.mxu0 %v313_v17 }
 0x192   :  { %v196_v38 = vpop.f32.mrf.mxu0 }
 0x193   :  { %v197_v39 = vadd.f32 %v196_v38, %v123_v36  ;;  %v394_v38 = vrot.slane %v377_v26, %v393_v29 }
 0x194   :  { %v198_v40 = vpop.f32.mrf.mxu0 }
 0x195   :  { %v199_v41 = vadd.f32 %v198_v40, %v127_v37  ;;  %v201_v43 = vmax.f32 %v197_v39, 0.0 }
 0x197   :  { %v202_v42 = vmax.f32 %v199_v41, 0.0 }
 0x199   :  { %306 = vmatprep.mubr.f32.mxu1 %v202_v42 }
 0x19a   :  { %307 = vmatmul.mubr.f32.vlgmr.msra.gmra.mxu1 %v201_v43 }
 0x19b   :  { %471 = vmatpush1.msra.mxu1 %v375_v44  ;;  %534 = vmatprep.mubr.f32.mxu1 %v747_v19  ;;  %v348_v19 = vld [vmem:[#allocation8 + $0x118] sm:$0xff] }
 0x19c   :  { %472 = vmatprep.subr.mxu1 %v372_v45 }
 0x19d   :  { %473 = vmatpush1.msra.mxu1 %v371_v46 }
 0x19e   :  { %474 = vmatprep.subr.mxu1 %v368_v47 }
 0x19f   :  { %475 = vmatpush1.msra.mxu1 %v367_v48 }
 0x1a0   :  { %476 = vmatprep.subr.mxu1 %v364_v49 }
 0x1a1   :  { %477 = vmatpush1.msra.mxu1 %v363_v50 }
 0x1a2   :  { %478 = vmatprep.subr.mxu1 %v360_v51 }
 0x1a3   :  { %479 = vmatpush1.msra.mxu1 %v359_v52 }
 0x1a4   :  { %480 = vmatprep.subr.mxu1 %v356_v53 }
 0x1a5   :  { %481 = vmatpush1.msra.mxu1 %v355_v54 }
 0x1a6   :  { %482 = vmatprep.subr.mxu1 %v352_v55 }
 0x1a7   :  { %483 = vmatpush1.msra.mxu1 %v351_v56 }
 0x1a8   :  { %484 = vmatprep.subr.mxu1 %v348_v19 }
 0x1a9   :  { %485 = vmatpush1.msra.mxu1 %v347_v57 }
 0x1aa   :  { %486 = vmatprep.subr.mxu1 %v344_v58 }
 0x1ab   :  { %487 = vmatpush1.msra.mxu1 %v343_v59 }
 0x1ac   :  { %488 = vmatprep.subr.mxu1 %v340_v60 }
 0x1ad   :  { %489 = vmatpush1.msra.mxu1 %v339_v61 }
 0x1ae   :  { %490 = vmatprep.subr.mxu1 %v336_v62 }
 0x1af   :  { %491 = vmatpush1.msra.mxu1 %v335_v63 }
 0x1b0   :  { %492 = vmatprep.subr.mxu1 %v332_v1 }
 0x1b1   :  { %493 = vmatpush1.msra.mxu1 %v331_v3 }
 0x1b2   :  { %494 = vmatprep.subr.mxu1 %v328_v5 }
 0x1b3   :  { %495 = vmatpush1.msra.mxu1 %v327_v0 }
 0x1b4   :  { %496 = vmatprep.subr.mxu1 %v324_v8 }
 0x1b5   :  { %497 = vmatpush1.msra.mxu1 %v323_v10 }
 0x1b6   :  { %498 = vmatprep.subr.mxu1 %v320_v12 }
 0x1b7   :  { %499 = vmatpush1.msra.mxu1 %v319_v14 }
 0x1b8   :  { %500 = vmatprep.subr.mxu1 %v316_v16 }
 0x1b9   :  { %501 = vmatpush1.msra.mxu1 %v315_v18 }
 0x25a   :  { %v610_v20 = vpop.f32.mrf.mxu1 }
 0x25c   :  { %v611_v22 = vpop.f32.mrf.mxu1 }
 0x25d   :  { %v612_v23 = vadd.f32 %v611_v22, %v610_v20 }
 0x25f   :  { %v309_v24 = vadd.f32 %v612_v23, %v577_v21 }
 0x261   :  { %v312_v25 = vmax.f32 %v309_v24, 0.0 }
 0x263   :  { %464 = vmatmul.mubr.f32.vlgmr.msra.gmra.mxu0 %v312_v25  ;;  %535 = vmatmul.mubr.f32.vlgmr.msra.gmra.mxu1 %v312_v25 }
 0x323   :  { %v465_v34 = vpop.f32.mrf.mxu0  ;;  %v536_v36 = vpop.f32.mrf.mxu1 }
 0x324   :  { %v466_v37 = vadd.f32 %v465_v34, %v382_v28  ;;  %v537_v41 = vadd.f32 %v536_v36, %v390_v30 }
 0x325   :  { %v467_v39 = vpop.f32.mrf.mxu0  ;;  %v538_v40 = vpop.f32.mrf.mxu1 }
 0x326   :  { %v468_v42 = vadd.f32 %v467_v39, %v386_v31  ;;  %v541_v43 = vmul.f32 %v466_v37, %v466_v37  ;;  %v539_v45 = vadd.f32 %v538_v40, %v394_v38  ;;  %v543_v46 = vmul.f32 %v537_v41, %v537_v41 }
 0x328   :  { %v542_v44 = vmul.f32 %v468_v42, %v468_v42  ;;  %v544_v33 = vmul.f32 %v539_v45, %v539_v45 }
 0x32a   :  { %v545_v47 = vadd.f32 %v542_v44, %v541_v43 }
 0x32c   :  { %v546_v48 = vadd.f32 %v545_v47, %v543_v46 }
 0x32e   :  { %v547_v49 = vadd.f32 %v546_v48, %v544_v33 }
 0x330   :  { %548 = vadd.xlane.f32.xlu0 %v547_v49 }
 0x3b9   :  { %v549_v50 = vpop.xlane.xlu0 %548 }
 0x3ba   :  { %v550_v32 = vmax.f32 %v549_v50, 1e-24 }
 0x3bc   :  { %627 = vrsqrt.f32 %v550_v32 }
 0x3c9   :  { %v628_v35 = vpop.eup %627 }
 0x3ca   :  { %v552_v51 = vmul.f32 %v628_v35, %v466_v37  ;;  %v553_v52 = vmul.f32 %v628_v35, %v468_v42  ;;  %v554_v53 = vmul.f32 %v628_v35, %v537_v41  ;;  %v555_v54 = vmul.f32 %v628_v35, %v539_v45 }
 0x3cc   :  { %556 = vst [vmem:[#allocation10] sm:$0xff] %v552_v51  ;;  %557 = vst [vmem:[#allocation10 + $0x8] sm:$0xff] %v553_v52 }
 0x3cd   :  { %558 = vst [vmem:[#allocation10 + $0x10] sm:$0xff] %v554_v53  ;;  %559 = vst [vmem:[#allocation10 + $0x18] sm:$0xff] %v555_v54 }
 0x3ce   :  { %720 = shalt.err (!%p717_p10)
}
 0x3cf   :  { %569 = dma.vmem_to_hbm [thread:$0]  %s567_s6, 512, %s842_s7, [#allocation4]  }
 0x3d0   :  { %735 = dma.done.wait [#allocation4], 512  }
 0x3d1   :  { %736 = vsyncadd [#allocation4], 4294966784 }
 0x3d2   :  { %573 = vsyncpa [#allocation3], 1 }
 0x3d3   :  { %574 = vsyncpa [#allocation6], 1 }
 0x3d4   :  { %575 = vsyncpa [#allocation9], 1 }
 0x3d5   :  { %576 = vsyncpa [#allocation4], 1 }

</bundles_post_ra>
